<compile_context>
chip_gen: v7x
topology: tpu7x:2x2x1
jax: 0.10.0
libtpu: 0.0.40
codegen_flags: <defaults>
</compile_context>

<pallas_src>
import functools

import jax
import jax.numpy as jnp
from jax import lax
from jax.experimental import pallas as pl
from jax.experimental.pallas import tpu as pltpu


# ---------------------------------------------------------------------------
# Pallas kernels
# ---------------------------------------------------------------------------
def _diag_col_row(gram):
    """Extract the diagonal of a square Gram block as a (m,1) column and a
    (1,m) row via a 2-D iota mask + axis reduces (XLU; no transpose/matmul)."""
    m = gram.shape[0]
    eye = (lax.broadcasted_iota(jnp.int32, (m, m), 0) ==
           lax.broadcasted_iota(jnp.int32, (m, m), 1))
    diag = jnp.where(eye, gram, 0.0)
    col = jnp.sum(diag, axis=1, keepdims=True)   # (m, 1)  ||x_i||^2
    row = jnp.sum(diag, axis=0, keepdims=True)   # (1, m)  ||x_j||^2
    return col, row


def _rbf_smmd_kernel(*refs, kernel_mul, kernel_num, fix_sigma, has_ppr):
    """refs = (src_ref, tgt_ref, [ppr_ref,] out_ref)."""
    if has_ppr:
        src_ref, tgt_ref, ppr_ref, out_ref = refs
    else:
        src_ref, tgt_ref, out_ref = refs
        ppr_ref = None

    src = src_ref[...]                       # (ns, d) native dtype
    tgt = tgt_ref[...]                       # (nt, d)
    ns = src.shape[0]
    nt = tgt.shape[0]
    n = ns + nt

    # Exact f32 MXU matmuls for f32 inputs (avoids cancellation drift in the
    # ||xi||^2 + ||xj||^2 - 2<xi,xj> formulation); bf16 inputs use the native
    # bf16 MXU path with f32 accumulation.
    prec = lax.Precision.HIGHEST if src.dtype == jnp.float32 else None
    dot_nt = functools.partial(
        lax.dot_general, dimension_numbers=(((1,), (1,)), ((), ())),
        preferred_element_type=jnp.float32, precision=prec)

    g_ss = dot_nt(src, src)                  # (ns, ns)
    g_tt = dot_nt(tgt, tgt)                  # (nt, nt)
    g_st = dot_nt(src, tgt)                  # (ns, nt)

    sq_s_col, sq_s_row = _diag_col_row(g_ss)
    sq_t_col, sq_t_row = _diag_col_row(g_tt)

    # Pairwise squared L2 distances, per quadrant (diag of xx/yy exactly 0).
    l2_ss = jnp.maximum(sq_s_col + sq_s_row - 2.0 * g_ss, 0.0)   # (ns, ns)
    l2_tt = jnp.maximum(sq_t_col + sq_t_row - 2.0 * g_tt, 0.0)   # (nt, nt)
    l2_st = jnp.maximum(sq_s_col + sq_t_row - 2.0 * g_st, 0.0)   # (ns, nt)

    # Bandwidth heuristic (matches the PyTorch reference; note `if fix_sigma:`
    # deliberately treats fix_sigma=0.0 as "not fixed", like the reference).
    if fix_sigma:
        bandwidth = jnp.float32(fix_sigma)
    else:
        total_l2 = (jnp.sum(l2_ss) + jnp.sum(l2_tt) + 2.0 * jnp.sum(l2_st))
        bandwidth = total_l2 / jnp.float32(n * n - n)
    bandwidth = bandwidth / jnp.float32(kernel_mul ** (kernel_num // 2))
    neg_inv_bw = -1.0 / bandwidth            # scalar; hoisted out of the loop

    if has_ppr:
        ppr = ppr_ref[...].astype(jnp.float32)

    # Multi-bandwidth Gaussian kernels, fused straight into quadrant sums
    # (no (n,n) kernel matrix is ever materialized).
    sum_xx = jnp.float32(0.0)
    sum_yy = jnp.float32(0.0)
    sum_xy = jnp.float32(0.0)
    for i in range(kernel_num):
        neg_scale = neg_inv_bw * jnp.float32(1.0 / (kernel_mul ** i))
        k_ss = jnp.exp(l2_ss * neg_scale)
        k_tt = jnp.exp(l2_tt * neg_scale)
        k_st = jnp.exp(l2_st * neg_scale)
        if has_ppr:
            sum_xx = sum_xx + jnp.sum(k_ss * ppr)
        else:
            sum_xx = sum_xx + jnp.sum(k_ss)
        sum_yy = sum_yy + jnp.sum(k_tt)
        sum_xy = sum_xy + jnp.sum(k_st)

    xx = sum_xx / jnp.float32(ns * ns)
    yy = sum_yy / jnp.float32(nt * nt)
    xy = sum_xy / jnp.float32(ns * nt)       # mean(K[b:, :b]) == mean(K[:b, b:])
    out_ref[0, 0] = xx + yy - 2.0 * xy


def _linear_mmd2_kernel(src_ref, tgt_ref, out_ref):
    src = src_ref[...].astype(jnp.float32)
    tgt = tgt_ref[...].astype(jnp.float32)
    delta = (jnp.mean(src, axis=0, keepdims=True) -
             jnp.mean(tgt, axis=0, keepdims=True))                # (1, d)
    out_ref[0, 0] = jnp.sum(delta * delta)


# ---------------------------------------------------------------------------
# VMEM sizing helper
# ---------------------------------------------------------------------------
def _rbf_vmem_limit_bytes(ns, nt, d, in_itemsize, has_ppr):
    blk_elems = ns * ns + nt * nt + ns * nt            # the three quadrant blocks
    temps = 4 * blk_elems * 4                          # ~4 live f32 block temporaries
    inputs = 2 * ((ns + nt) * d * in_itemsize + (ns * ns * 4 if has_ppr else 0))
    est = temps + inputs + (2 << 20)                   # headroom
    # keep within v7x physical VMEM (64 MiB) so the same code runs on v5e/v6e/v7x
    return int(min(max(est, 8 << 20), 64 << 20))


# ---------------------------------------------------------------------------
# Wrapper (mirrors the PyTorch SMMDLoss API; stateless -> no params)
# ---------------------------------------------------------------------------
class SMMDLoss:
    def __init__(self, kernel_type='rbf', kernel_mul=2.0, kernel_num=5,
                 fix_sigma=None, **kwargs):
        if kernel_type not in ('linear', 'rbf'):
            raise ValueError("kernel_type must be either 'linear' or 'rbf'")
        self.kernel_type = kernel_type
        self.kernel_mul = float(kernel_mul)
        self.kernel_num = int(kernel_num)
        self.fix_sigma = fix_sigma

    def __call__(self, source, target, ppr=None):
        if self.kernel_type == 'linear':
            out = pl.pallas_call(
                _linear_mmd2_kernel,
                out_shape=jax.ShapeDtypeStruct((1, 1), jnp.float32),
                in_specs=[pl.BlockSpec(memory_space=pltpu.MemorySpace.VMEM),
                          pl.BlockSpec(memory_space=pltpu.MemorySpace.VMEM)],
                out_specs=pl.BlockSpec(memory_space=pltpu.MemorySpace.SMEM),
                compiler_params=pltpu.CompilerParams(
                    vmem_limit_bytes=8 << 20),
            )(source, target)
            return out[0, 0]

        # RBF path (no host-side concat; quadrant blocks computed in-kernel).
        ns, d = source.shape
        nt = target.shape[0]
        has_ppr = ppr is not None

        kern = functools.partial(
            _rbf_smmd_kernel, kernel_mul=self.kernel_mul,
            kernel_num=self.kernel_num, fix_sigma=self.fix_sigma,
            has_ppr=has_ppr)

        n_in = 3 if has_ppr else 2
        in_specs = [pl.BlockSpec(memory_space=pltpu.MemorySpace.VMEM)] * n_in
        args = (source, target)
        if has_ppr:
            args = args + (jnp.asarray(ppr, jnp.float32),)

        out = pl.pallas_call(
            kern,
            out_shape=jax.ShapeDtypeStruct((1, 1), jnp.float32),
            in_specs=in_specs,
            out_specs=pl.BlockSpec(memory_space=pltpu.MemorySpace.SMEM),
            compiler_params=pltpu.CompilerParams(
                vmem_limit_bytes=_rbf_vmem_limit_bytes(
                    ns, nt, d, jnp.dtype(source.dtype).itemsize, has_ppr)),
        )(*args)
        return out[0, 0]


# ---------------------------------------------------------------------------
# Pure-JAX reference (mirrors the PyTorch forward) for correctness checking
# ---------------------------------------------------------------------------
def _reference_rbf_smmd(source, target, ppr, kernel_mul, kernel_num, fix_sigma):
    b = source.shape[0]
    total = jnp.concatenate([source, target], axis=0).astype(jnp.float32)
    n = total.shape[0]
    diff = total[None, :, :] - total[:, None, :]
    l2 = jnp.sum(diff * diff, axis=2)
    if fix_sigma:
        bandwidth = jnp.float32(fix_sigma)
    else:
        bandwidth = jnp.sum(l2) / (n * n - n)
    bandwidth = bandwidth / (kernel_mul ** (kernel_num // 2))
    kernels = sum(jnp.exp(-l2 / (bandwidth * kernel_mul ** i))
                  for i in range(kernel_num))
    if ppr is None:
        xx = jnp.mean(kernels[:b, :b])
    else:
        xx = jnp.mean(kernels[:b, :b] * ppr)
    yy = jnp.mean(kernels[b:, b:])
    xy = jnp.mean(kernels[:b, b:])
    yx = jnp.mean(kernels[b:, :b])
    return xx + yy - xy - yx


def _reference_linear_mmd2(source, target):
    delta = jnp.mean(source.astype(jnp.float32), 0) - \
            jnp.mean(target.astype(jnp.float32), 0)
    return jnp.dot(delta, delta)


# ---------------------------------------------------------------------------
if __name__ == "__main__":
    key = jax.random.PRNGKey(0)
    k1, k2, k3 = jax.random.split(key, 3)
    B, D = 8, 32
    source = jax.random.normal(k1, (B, D), jnp.float32)
    target = jax.random.normal(k2, (B, D), jnp.float32) + 0.5
    ppr = jax.nn.softmax(jax.random.normal(k3, (B, B), jnp.float32), axis=-1)

    rbf_loss_fn = SMMDLoss(kernel_type='rbf', kernel_mul=2.0, kernel_num=5)
    lin_loss_fn = SMMDLoss(kernel_type='linear')

    loss_rbf = rbf_loss_fn(source, target)
    loss_rbf_ppr = rbf_loss_fn(source, target, ppr=ppr)
    loss_lin = lin_loss_fn(source, target)
    jax.block_until_ready((loss_rbf, loss_rbf_ppr, loss_lin))

    ref_rbf = _reference_rbf_smmd(source, target, None, 2.0, 5, None)
    ref_rbf_ppr = _reference_rbf_smmd(source, target, ppr, 2.0, 5, None)
    ref_lin = _reference_linear_mmd2(source, target)

    def _close(a, b, tol=1e-4):
        return abs(float(a) - float(b)) < tol * max(1.0, abs(float(b)))

    assert _close(loss_rbf, ref_rbf), (loss_rbf, ref_rbf)
    assert _close(loss_rbf_ppr, ref_rbf_ppr), (loss_rbf_ppr, ref_rbf_ppr)
    assert _close(loss_lin, ref_lin), (loss_lin, ref_lin)

    print("KERNEL_OK")
</pallas_src>

<mosaic_0001>
module attributes {stable_mosaic.version = 11 : i64} {
  func.func @_rbf_smmd_kernel(%arg0: memref<8x32xf32, #tpu.memory_space<vmem>>, %arg1: memref<8x32xf32, #tpu.memory_space<vmem>>, %arg2: memref<1x1xf32, #tpu.memory_space<smem>>) attributes {dimension_semantics = [], scalar_prefetch = 0 : i64, scratch_operands = 0 : i64, tpu.core_type = #tpu.core_type<tc>} {
    %c0 = arith.constant 0 : index
    %c0_0 = arith.constant 0 : index
    %0 = vector.load %arg0[%c0, %c0_0] : memref<8x32xf32, #tpu.memory_space<vmem>>, vector<8x32xf32>
    %c0_1 = arith.constant 0 : index
    %c0_2 = arith.constant 0 : index
    %1 = vector.load %arg1[%c0_1, %c0_2] : memref<8x32xf32, #tpu.memory_space<vmem>>, vector<8x32xf32>
    %cst = arith.constant dense<0.000000e+00> : vector<8x8xf32>
    %2 = tpu.matmul %0, %0, %cst {dimension_numbers = #tpu.dot_dimension_numbers<[1], [1], [0], [0], [0, 0, 1, 0], [], []>, precision = #tpu.contract_precision<fp32>} : vector<8x32xf32>, vector<8x32xf32>, vector<8x8xf32> -> vector<8x8xf32>
    %cst_3 = arith.constant dense<0.000000e+00> : vector<8x8xf32>
    %3 = tpu.matmul %1, %1, %cst_3 {dimension_numbers = #tpu.dot_dimension_numbers<[1], [1], [0], [0], [0, 0, 1, 0], [], []>, precision = #tpu.contract_precision<fp32>} : vector<8x32xf32>, vector<8x32xf32>, vector<8x8xf32> -> vector<8x8xf32>
    %cst_4 = arith.constant dense<0.000000e+00> : vector<8x8xf32>
    %4 = tpu.matmul %0, %1, %cst_4 {dimension_numbers = #tpu.dot_dimension_numbers<[1], [1], [0], [0], [0, 0, 1, 0], [], []>, precision = #tpu.contract_precision<fp32>} : vector<8x32xf32>, vector<8x32xf32>, vector<8x8xf32> -> vector<8x8xf32>
    %5 = tpu.iota {dimensions = array<i32: 0>} : vector<8x8xi32>
    %6 = tpu.iota {dimensions = array<i32: 1>} : vector<8x8xi32>
    %7 = arith.cmpi eq, %5, %6 : vector<8x8xi32>
    %cst_5 = arith.constant 0.000000e+00 : f32
    %8 = vector.broadcast %cst_5 : f32 to vector<8x8xf32>
    %9 = arith.select %7, %2, %8 : vector<8x8xi1>, vector<8x8xf32>
    %cst_6 = arith.constant dense<0.000000e+00> : vector<8xf32>
    %10 = vector.multi_reduction <add>, %9, %cst_6 [1] : vector<8x8xf32> to vector<8xf32>
    %11 = vector.shape_cast %10 : vector<8xf32> to vector<8x1xf32>
    %cst_7 = arith.constant dense<0.000000e+00> : vector<8xf32>
    %12 = vector.multi_reduction <add>, %9, %cst_7 [0] : vector<8x8xf32> to vector<8xf32>
    %13 = vector.shape_cast %12 : vector<8xf32> to vector<1x8xf32>
    %14 = tpu.iota {dimensions = array<i32: 0>} : vector<8x8xi32>
    %15 = tpu.iota {dimensions = array<i32: 1>} : vector<8x8xi32>
    %16 = arith.cmpi eq, %14, %15 : vector<8x8xi32>
    %cst_8 = arith.constant 0.000000e+00 : f32
    %17 = vector.broadcast %cst_8 : f32 to vector<8x8xf32>
    %18 = arith.select %16, %3, %17 : vector<8x8xi1>, vector<8x8xf32>
    %cst_9 = arith.constant dense<0.000000e+00> : vector<8xf32>
    %19 = vector.multi_reduction <add>, %18, %cst_9 [1] : vector<8x8xf32> to vector<8xf32>
    %20 = vector.shape_cast %19 : vector<8xf32> to vector<8x1xf32>
    %cst_10 = arith.constant dense<0.000000e+00> : vector<8xf32>
    %21 = vector.multi_reduction <add>, %18, %cst_10 [0] : vector<8x8xf32> to vector<8xf32>
    %22 = vector.shape_cast %21 : vector<8xf32> to vector<1x8xf32>
    %23 = vector.broadcast %11 : vector<8x1xf32> to vector<8x8xf32>
    %24 = vector.broadcast %13 : vector<1x8xf32> to vector<8x8xf32>
    %25 = arith.addf %23, %24 : vector<8x8xf32>
    %cst_11 = arith.constant 2.000000e+00 : f32
    %26 = vector.broadcast %cst_11 : f32 to vector<8x8xf32>
    %27 = arith.mulf %26, %2 : vector<8x8xf32>
    %28 = arith.subf %25, %27 : vector<8x8xf32>
    %cst_12 = arith.constant 0.000000e+00 : f32
    %29 = vector.broadcast %cst_12 : f32 to vector<8x8xf32>
    %30 = arith.maximumf %28, %29 : vector<8x8xf32>
    %31 = vector.broadcast %20 : vector<8x1xf32> to vector<8x8xf32>
    %32 = vector.broadcast %22 : vector<1x8xf32> to vector<8x8xf32>
    %33 = arith.addf %31, %32 : vector<8x8xf32>
    %cst_13 = arith.constant 2.000000e+00 : f32
    %34 = vector.broadcast %cst_13 : f32 to vector<8x8xf32>
    %35 = arith.mulf %34, %3 : vector<8x8xf32>
    %36 = arith.subf %33, %35 : vector<8x8xf32>
    %cst_14 = arith.constant 0.000000e+00 : f32
    %37 = vector.broadcast %cst_14 : f32 to vector<8x8xf32>
    %38 = arith.maximumf %36, %37 : vector<8x8xf32>
    %39 = vector.broadcast %11 : vector<8x1xf32> to vector<8x8xf32>
    %40 = vector.broadcast %22 : vector<1x8xf32> to vector<8x8xf32>
    %41 = arith.addf %39, %40 : vector<8x8xf32>
    %cst_15 = arith.constant 2.000000e+00 : f32
    %42 = vector.broadcast %cst_15 : f32 to vector<8x8xf32>
    %43 = arith.mulf %42, %4 : vector<8x8xf32>
    %44 = arith.subf %41, %43 : vector<8x8xf32>
    %cst_16 = arith.constant 0.000000e+00 : f32
    %45 = vector.broadcast %cst_16 : f32 to vector<8x8xf32>
    %46 = arith.maximumf %44, %45 : vector<8x8xf32>
    %47 = vector.shape_cast %30 : vector<8x8xf32> to vector<1x8x8xf32>
    %cst_17 = arith.constant dense<0.000000e+00> : vector<1xf32>
    %48 = vector.multi_reduction <add>, %47, %cst_17 [1, 2] : vector<1x8x8xf32> to vector<1xf32>
    %49 = vector.shape_cast %48 : vector<1xf32> to vector<1x1x1xf32>
    %50 = vector.extract %49[0, 0, 0] : f32 from vector<1x1x1xf32>
    %51 = vector.shape_cast %38 : vector<8x8xf32> to vector<1x8x8xf32>
    %cst_18 = arith.constant dense<0.000000e+00> : vector<1xf32>
    %52 = vector.multi_reduction <add>, %51, %cst_18 [1, 2] : vector<1x8x8xf32> to vector<1xf32>
    %53 = vector.shape_cast %52 : vector<1xf32> to vector<1x1x1xf32>
    %54 = vector.extract %53[0, 0, 0] : f32 from vector<1x1x1xf32>
    %55 = arith.addf %50, %54 : f32
    %56 = vector.shape_cast %46 : vector<8x8xf32> to vector<1x8x8xf32>
    %cst_19 = arith.constant dense<0.000000e+00> : vector<1xf32>
    %57 = vector.multi_reduction <add>, %56, %cst_19 [1, 2] : vector<1x8x8xf32> to vector<1xf32>
    %58 = vector.shape_cast %57 : vector<1xf32> to vector<1x1x1xf32>
    %59 = vector.extract %58[0, 0, 0] : f32 from vector<1x1x1xf32>
    %cst_20 = arith.constant 2.000000e+00 : f32
    %60 = arith.mulf %cst_20, %59 : f32
    %61 = arith.addf %55, %60 : f32
    %cst_21 = arith.constant 2.400000e+02 : f32
    %62 = arith.divf %61, %cst_21 : f32
    %cst_22 = arith.constant 4.000000e+00 : f32
    %63 = arith.divf %62, %cst_22 : f32
    %cst_23 = arith.constant -1.000000e+00 : f32
    %64 = arith.divf %cst_23, %63 : f32
    %cst_24 = arith.constant 1.000000e+00 : f32
    %65 = arith.mulf %64, %cst_24 : f32
    %66 = vector.broadcast %65 : f32 to vector<8x8xf32>
    %67 = arith.mulf %30, %66 : vector<8x8xf32>
    %68 = math.exp %67 : vector<8x8xf32>
    %69 = vector.broadcast %65 : f32 to vector<8x8xf32>
    %70 = arith.mulf %38, %69 : vector<8x8xf32>
    %71 = math.exp %70 : vector<8x8xf32>
    %72 = vector.broadcast %65 : f32 to vector<8x8xf32>
    %73 = arith.mulf %46, %72 : vector<8x8xf32>
    %74 = math.exp %73 : vector<8x8xf32>
    %75 = vector.shape_cast %68 : vector<8x8xf32> to vector<1x8x8xf32>
    %cst_25 = arith.constant dense<0.000000e+00> : vector<1xf32>
    %76 = vector.multi_reduction <add>, %75, %cst_25 [1, 2] : vector<1x8x8xf32> to vector<1xf32>
    %77 = vector.shape_cast %76 : vector<1xf32> to vector<1x1x1xf32>
    %78 = vector.extract %77[0, 0, 0] : f32 from vector<1x1x1xf32>
    %cst_26 = arith.constant 0.000000e+00 : f32
    %79 = arith.addf %cst_26, %78 : f32
    %80 = vector.shape_cast %71 : vector<8x8xf32> to vector<1x8x8xf32>
    %cst_27 = arith.constant dense<0.000000e+00> : vector<1xf32>
    %81 = vector.multi_reduction <add>, %80, %cst_27 [1, 2] : vector<1x8x8xf32> to vector<1xf32>
    %82 = vector.shape_cast %81 : vector<1xf32> to vector<1x1x1xf32>
    %83 = vector.extract %82[0, 0, 0] : f32 from vector<1x1x1xf32>
    %cst_28 = arith.constant 0.000000e+00 : f32
    %84 = arith.addf %cst_28, %83 : f32
    %85 = vector.shape_cast %74 : vector<8x8xf32> to vector<1x8x8xf32>
    %cst_29 = arith.constant dense<0.000000e+00> : vector<1xf32>
    %86 = vector.multi_reduction <add>, %85, %cst_29 [1, 2] : vector<1x8x8xf32> to vector<1xf32>
    %87 = vector.shape_cast %86 : vector<1xf32> to vector<1x1x1xf32>
    %88 = vector.extract %87[0, 0, 0] : f32 from vector<1x1x1xf32>
    %cst_30 = arith.constant 0.000000e+00 : f32
    %89 = arith.addf %cst_30, %88 : f32
    %cst_31 = arith.constant 5.000000e-01 : f32
    %90 = arith.mulf %64, %cst_31 : f32
    %91 = vector.broadcast %90 : f32 to vector<8x8xf32>
    %92 = arith.mulf %30, %91 : vector<8x8xf32>
    %93 = math.exp %92 : vector<8x8xf32>
    %94 = vector.broadcast %90 : f32 to vector<8x8xf32>
    %95 = arith.mulf %38, %94 : vector<8x8xf32>
    %96 = math.exp %95 : vector<8x8xf32>
    %97 = vector.broadcast %90 : f32 to vector<8x8xf32>
    %98 = arith.mulf %46, %97 : vector<8x8xf32>
    %99 = math.exp %98 : vector<8x8xf32>
    %100 = vector.shape_cast %93 : vector<8x8xf32> to vector<1x8x8xf32>
    %cst_32 = arith.constant dense<0.000000e+00> : vector<1xf32>
    %101 = vector.multi_reduction <add>, %100, %cst_32 [1, 2] : vector<1x8x8xf32> to vector<1xf32>
    %102 = vector.shape_cast %101 : vector<1xf32> to vector<1x1x1xf32>
    %103 = vector.extract %102[0, 0, 0] : f32 from vector<1x1x1xf32>
    %104 = arith.addf %79, %103 : f32
    %105 = vector.shape_cast %96 : vector<8x8xf32> to vector<1x8x8xf32>
    %cst_33 = arith.constant dense<0.000000e+00> : vector<1xf32>
    %106 = vector.multi_reduction <add>, %105, %cst_33 [1, 2] : vector<1x8x8xf32> to vector<1xf32>
    %107 = vector.shape_cast %106 : vector<1xf32> to vector<1x1x1xf32>
    %108 = vector.extract %107[0, 0, 0] : f32 from vector<1x1x1xf32>
    %109 = arith.addf %84, %108 : f32
    %110 = vector.shape_cast %99 : vector<8x8xf32> to vector<1x8x8xf32>
    %cst_34 = arith.constant dense<0.000000e+00> : vector<1xf32>
    %111 = vector.multi_reduction <add>, %110, %cst_34 [1, 2] : vector<1x8x8xf32> to vector<1xf32>
    %112 = vector.shape_cast %111 : vector<1xf32> to vector<1x1x1xf32>
    %113 = vector.extract %112[0, 0, 0] : f32 from vector<1x1x1xf32>
    %114 = arith.addf %89, %113 : f32
    %cst_35 = arith.constant 2.500000e-01 : f32
    %115 = arith.mulf %64, %cst_35 : f32
    %116 = vector.broadcast %115 : f32 to vector<8x8xf32>
    %117 = arith.mulf %30, %116 : vector<8x8xf32>
    %118 = math.exp %117 : vector<8x8xf32>
    %119 = vector.broadcast %115 : f32 to vector<8x8xf32>
    %120 = arith.mulf %38, %119 : vector<8x8xf32>
    %121 = math.exp %120 : vector<8x8xf32>
    %122 = vector.broadcast %115 : f32 to vector<8x8xf32>
    %123 = arith.mulf %46, %122 : vector<8x8xf32>
    %124 = math.exp %123 : vector<8x8xf32>
    %125 = vector.shape_cast %118 : vector<8x8xf32> to vector<1x8x8xf32>
    %cst_36 = arith.constant dense<0.000000e+00> : vector<1xf32>
    %126 = vector.multi_reduction <add>, %125, %cst_36 [1, 2] : vector<1x8x8xf32> to vector<1xf32>
    %127 = vector.shape_cast %126 : vector<1xf32> to vector<1x1x1xf32>
    %128 = vector.extract %127[0, 0, 0] : f32 from vector<1x1x1xf32>
    %129 = arith.addf %104, %128 : f32
    %130 = vector.shape_cast %121 : vector<8x8xf32> to vector<1x8x8xf32>
    %cst_37 = arith.constant dense<0.000000e+00> : vector<1xf32>
    %131 = vector.multi_reduction <add>, %130, %cst_37 [1, 2] : vector<1x8x8xf32> to vector<1xf32>
    %132 = vector.shape_cast %131 : vector<1xf32> to vector<1x1x1xf32>
    %133 = vector.extract %132[0, 0, 0] : f32 from vector<1x1x1xf32>
    %134 = arith.addf %109, %133 : f32
    %135 = vector.shape_cast %124 : vector<8x8xf32> to vector<1x8x8xf32>
    %cst_38 = arith.constant dense<0.000000e+00> : vector<1xf32>
    %136 = vector.multi_reduction <add>, %135, %cst_38 [1, 2] : vector<1x8x8xf32> to vector<1xf32>
    %137 = vector.shape_cast %136 : vector<1xf32> to vector<1x1x1xf32>
    %138 = vector.extract %137[0, 0, 0] : f32 from vector<1x1x1xf32>
    %139 = arith.addf %114, %138 : f32
    %cst_39 = arith.constant 1.250000e-01 : f32
    %140 = arith.mulf %64, %cst_39 : f32
    %141 = vector.broadcast %140 : f32 to vector<8x8xf32>
    %142 = arith.mulf %30, %141 : vector<8x8xf32>
    %143 = math.exp %142 : vector<8x8xf32>
    %144 = vector.broadcast %140 : f32 to vector<8x8xf32>
    %145 = arith.mulf %38, %144 : vector<8x8xf32>
    %146 = math.exp %145 : vector<8x8xf32>
    %147 = vector.broadcast %140 : f32 to vector<8x8xf32>
    %148 = arith.mulf %46, %147 : vector<8x8xf32>
    %149 = math.exp %148 : vector<8x8xf32>
    %150 = vector.shape_cast %143 : vector<8x8xf32> to vector<1x8x8xf32>
    %cst_40 = arith.constant dense<0.000000e+00> : vector<1xf32>
    %151 = vector.multi_reduction <add>, %150, %cst_40 [1, 2] : vector<1x8x8xf32> to vector<1xf32>
    %152 = vector.shape_cast %151 : vector<1xf32> to vector<1x1x1xf32>
    %153 = vector.extract %152[0, 0, 0] : f32 from vector<1x1x1xf32>
    %154 = arith.addf %129, %153 : f32
    %155 = vector.shape_cast %146 : vector<8x8xf32> to vector<1x8x8xf32>
    %cst_41 = arith.constant dense<0.000000e+00> : vector<1xf32>
    %156 = vector.multi_reduction <add>, %155, %cst_41 [1, 2] : vector<1x8x8xf32> to vector<1xf32>
    %157 = vector.shape_cast %156 : vector<1xf32> to vector<1x1x1xf32>
    %158 = vector.extract %157[0, 0, 0] : f32 from vector<1x1x1xf32>
    %159 = arith.addf %134, %158 : f32
    %160 = vector.shape_cast %149 : vector<8x8xf32> to vector<1x8x8xf32>
    %cst_42 = arith.constant dense<0.000000e+00> : vector<1xf32>
    %161 = vector.multi_reduction <add>, %160, %cst_42 [1, 2] : vector<1x8x8xf32> to vector<1xf32>
    %162 = vector.shape_cast %161 : vector<1xf32> to vector<1x1x1xf32>
    %163 = vector.extract %162[0, 0, 0] : f32 from vector<1x1x1xf32>
    %164 = arith.addf %139, %163 : f32
    %cst_43 = arith.constant 6.250000e-02 : f32
    %165 = arith.mulf %64, %cst_43 : f32
    %166 = vector.broadcast %165 : f32 to vector<8x8xf32>
    %167 = arith.mulf %30, %166 : vector<8x8xf32>
    %168 = math.exp %167 : vector<8x8xf32>
    %169 = vector.broadcast %165 : f32 to vector<8x8xf32>
    %170 = arith.mulf %38, %169 : vector<8x8xf32>
    %171 = math.exp %170 : vector<8x8xf32>
    %172 = vector.broadcast %165 : f32 to vector<8x8xf32>
    %173 = arith.mulf %46, %172 : vector<8x8xf32>
    %174 = math.exp %173 : vector<8x8xf32>
    %175 = vector.shape_cast %168 : vector<8x8xf32> to vector<1x8x8xf32>
    %cst_44 = arith.constant dense<0.000000e+00> : vector<1xf32>
    %176 = vector.multi_reduction <add>, %175, %cst_44 [1, 2] : vector<1x8x8xf32> to vector<1xf32>
    %177 = vector.shape_cast %176 : vector<1xf32> to vector<1x1x1xf32>
    %178 = vector.extract %177[0, 0, 0] : f32 from vector<1x1x1xf32>
    %179 = arith.addf %154, %178 : f32
    %180 = vector.shape_cast %171 : vector<8x8xf32> to vector<1x8x8xf32>
    %cst_45 = arith.constant dense<0.000000e+00> : vector<1xf32>
    %181 = vector.multi_reduction <add>, %180, %cst_45 [1, 2] : vector<1x8x8xf32> to vector<1xf32>
    %182 = vector.shape_cast %181 : vector<1xf32> to vector<1x1x1xf32>
    %183 = vector.extract %182[0, 0, 0] : f32 from vector<1x1x1xf32>
    %184 = arith.addf %159, %183 : f32
    %185 = vector.shape_cast %174 : vector<8x8xf32> to vector<1x8x8xf32>
    %cst_46 = arith.constant dense<0.000000e+00> : vector<1xf32>
    %186 = vector.multi_reduction <add>, %185, %cst_46 [1, 2] : vector<1x8x8xf32> to vector<1xf32>
    %187 = vector.shape_cast %186 : vector<1xf32> to vector<1x1x1xf32>
    %188 = vector.extract %187[0, 0, 0] : f32 from vector<1x1x1xf32>
    %189 = arith.addf %164, %188 : f32
    %cst_47 = arith.constant 6.400000e+01 : f32
    %190 = arith.divf %179, %cst_47 : f32
    %cst_48 = arith.constant 6.400000e+01 : f32
    %191 = arith.divf %184, %cst_48 : f32
    %cst_49 = arith.constant 6.400000e+01 : f32
    %192 = arith.divf %189, %cst_49 : f32
    %193 = arith.addf %190, %191 : f32
    %cst_50 = arith.constant 2.000000e+00 : f32
    %194 = arith.mulf %cst_50, %192 : f32
    %195 = arith.subf %193, %194 : f32
    %c0_51 = arith.constant 0 : index
    %c0_52 = arith.constant 0 : index
    %196 = memref.load %arg2[%c0_51, %c0_52] : memref<1x1xf32, #tpu.memory_space<smem>>
    memref.store %195, %arg2[%c0_51, %c0_52] : memref<1x1xf32, #tpu.memory_space<smem>>
    return
  }
}

</mosaic_0001>

<bundles_post_ra>
// kernel: tpu_custom_call.1
= control target key start
LH: loop header
LB: loop body
LE: loop exit
PB: predicated region body
PF: predicated region fallthrough
CT: control target
= control target key end

     0   :  { %7 = vsyncpa [#allocation3], 0  ;;  %s2187_s0 = inlined_call_operand.hbm [shape: f32[8,32], index: 0, kind: input, shape index: {}]   ;;  %s2188_s1 = inlined_call_operand.hbm [shape: f32[8,32], index: 1, kind: input, shape index: {}]   ;;  %s2189_s2 = inlined_call_operand.hbm [shape: f32[1,1], index: 2, kind: output, shape index: {}]  }
   0x1   :  { %8 = vsyncpa [#allocation6], 0 }
   0x2   :  { %9 = vsyncpa [#allocation4], 0  ;;  %s2002_s9 = smov [#allocation2]   ;;  %s2003_s11 = smov [#allocation5]  }
   0x3   :  { %s16_s10 = sshll.u32 %s2002_s9, 4  ;;  %s26_s12 = sshll.u32 %s2003_s11, 4  ;;  %s17_s10 = int_to_ptr.vmem [resolvable:$true] %s16_s10  ;;  %s27_s12 = int_to_ptr.vmem [resolvable:$true] %s26_s12 }
   0x4   :  { %s1942_s15 = scalar_lea.hbm %s2187_s0, 128 }
   0x5   :  { %p1943_p0 = scmp.ne.s32.totalorder %s2187_s0, %s1942_s15  ;;  %p1946_p1 = scmp.lt.u32.totalorder %s1942_s15, %s2187_s0 }
   0x7   :  { %p1948_p2 = pnand %p1946_p1, %p1943_p0 }
   0x9   :  { %1951 = shalt.err (!%p1948_p2)
}
   0xa   :  { %s1952_s20 = scalar_lea.vmem %s17_s10, 128  ;;  %p1957_p4 = scmp.lt.s32.totalorder %s17_s10, %s17_s10 }
   0xb   :  { %p1953_p3 = scmp.ne.s32.totalorder %s17_s10, %s1952_s20  ;;  %p1958_p5 = scmp.lt.s32.totalorder %s1952_s20, %s1952_s20 }
   0xd   :  { %p1959_p6 = por %p1958_p5, %p1957_p4 }
   0xf   :  { %p1960_p7 = pnand %p1959_p6, %p1953_p3 }
  0x11   :  { %1963 = shalt.err (!%p1960_p7)
}
  0x12   :  { %19 = dma.hbm_to_vmem [thread:$0]  %s2187_s0, 128, %s17_s10, [#allocation3]  }
  0x13   :  { %s1964_s25 = scalar_lea.hbm %s2188_s1, 128 }
  0x14   :  { %p1965_p8 = scmp.ne.s32.totalorder %s2188_s1, %s1964_s25  ;;  %p1968_p9 = scmp.lt.u32.totalorder %s1964_s25, %s2188_s1 }
  0x16   :  { %p1970_p10 = pnand %p1968_p9, %p1965_p8 }
  0x18   :  { %1973 = shalt.err (!%p1970_p10)
}
  0x19   :  { %s1974_s30 = scalar_lea.vmem %s27_s12, 128  ;;  %p1979_p12 = scmp.lt.s32.totalorder %s27_s12, %s27_s12 }
  0x1a   :  { %p1975_p11 = scmp.ne.s32.totalorder %s27_s12, %s1974_s30  ;;  %p1980_p13 = scmp.lt.s32.totalorder %s1974_s30, %s1974_s30 }
  0x1c   :  { %p1981_p0 = por %p1980_p13, %p1979_p12 }
  0x1e   :  { %p1982_p1 = pnand %p1981_p0, %p1975_p11 }
  0x20   :  { %1985 = shalt.err (!%p1982_p1)
}
  0x21   :  { %29 = dma.hbm_to_vmem [thread:$0]  %s2188_s1, 128, %s27_s12, [#allocation6]  }
  0x22   :  { %1996 = dma.done.wait [#allocation3], 128  }
  0x23   :  { %1997 = vsyncadd [#allocation3], 4294967168 }
  0x24   :  { %1998 = dma.done.wait [#allocation6], 128  }
  0x25   :  { %1999 = vsyncadd [#allocation6], 4294967168  ;;  %v2004_v0 = vmov 0.0   ;;  %vm2005_vm0 = vmmov 0   ;;  %vm38_vm1 = vcmask 261120   ;;  %v36_v1 = vld [vmem:[#allocation2] sm:$0xff]  ;;  %v1383_v15 = vlaneseq }
  0x26   :  { %1748 = vmatprep.subr.mxu1 %v2004_v0  ;;  %1763 = vmatprep.subr.mxu0 %v2004_v0  ;;  %v40_v2 = vsel %vm38_vm1, %v36_v1, 0  ;;  %v37_v5 = vld [vmem:[#allocation5] sm:$0xff]  ;;  %vm1389_vm3 = vcmask 64512  }
  0x27   :  { %1750 = vmatprep.mubr.msk.f32.mxu1 %vm2005_vm0, %v2004_v0  ;;  %1765 = vmatprep.mubr.msk.f32.mxu0 %vm2005_vm0, %v2004_v0  ;;  %v2052_v3 = vand.u32 4294901760, %v40_v2  ;;  %v489_v8 = vsel %vm38_vm1, %v37_v5, 0  ;;  %v1384_v17 = vshrl.u32 %v1383_v15, 7  ;;  %v1386_v18 = vand.u32 127, %v1383_v15 }
  0x28   :  { %v2062_v10 = vand.u32 4294901760, %v489_v8 }
  0x29   :  { %1749 = vmatpush3.xpose.msra.mxu1 %v2052_v3  ;;  %1764 = vmatpush3.xpose.msra.mxu0 %v2052_v3  ;;  %v109_v4 = vsub.f32 %v40_v2, %v2052_v3  ;;  %vm1387_vm2 = vcmp.eq.s32.totalorder %v1384_v17, %v1386_v18 }
  0x2a   :  { %1753 = vmatprep.subr.mxu1 %v2004_v0  ;;  %1768 = vmatprep.subr.mxu0 %v2004_v0  ;;  %v558_v11 = vsub.f32 %v489_v8, %v2062_v10 }
  0x2b   :  { %v110_v6 = vand.u32 4294901760, %v109_v4 }
  0x2c   :  { %v559_v12 = vand.u32 4294901760, %v558_v11 }
  0x2d   :  { %v111_v7 = vsub.f32 %v109_v4, %v110_v6  ;;  %1766 = vmatmul.mubr.f32.vlgmr.msra.gmra.mrb[0].mxu0 %v110_v6 }
  0x2e   :  { %1769 = vmatpush3.xpose.msra.mxu0 %v110_v6  ;;  %1770 = vmatprep.mubr.msk.f32.mxu0 %vm2005_vm0, %v2004_v0  ;;  %v560_v13 = vsub.f32 %v558_v11, %v559_v12 }
  0x2f   :  { %v112_v9 = vand.u32 4294901760, %v111_v7  ;;  %1773 = vmatprep.subr.mxu0 %v2004_v0 }
  0x30   :  { %v561_v14 = vand.u32 4294901760, %v560_v13 }
  0x31   :  { %1751 = vmatmul.mubr.f32.vlgmr.msra.gmra.mrb[0].mxu1 %v112_v9 }
  0x32   :  { %1754 = vmatpush3.xpose.msra.mxu1 %v112_v9  ;;  %1755 = vmatprep.mubr.msk.f32.mxu1 %vm2005_vm0, %v2004_v0 }
  0x33   :  { %1758 = vmatprep.subr.mxu1 %v2004_v0 }
  0x35   :  { %1771 = vmatmul.mubr.f32.vlgmr.msra.gmra.mrb[0].mxu0 %v2052_v3 }
  0x36   :  { %1774 = vmatpush3.xpose.msra.mxu0 %v2052_v3  ;;  %1775 = vmatprep.mubr.msk.f32.mxu0 %vm2005_vm0, %v2004_v0 }
  0x37   :  { %1808 = vmatprep.subr.mxu0 %v2004_v0 }
  0x39   :  { %1756 = vmatmul.mubr.f32.vlgmr.msra.gmra.mrb[0].mxu1 %v2052_v3 }
  0x3a   :  { %1759 = vmatpush3.xpose.msra.mxu1 %v109_v4  ;;  %1760 = vmatprep.mubr.msk.f32.mxu1 %vm2005_vm0, %v2004_v0 }
  0x3b   :  { %1778 = vmatprep.subr.mxu1 %v2004_v0 }
  0x3d   :  { %1776 = vmatmul.mubr.f32.vlgmr.msra.gmra.mrb[0].mxu0 %v2052_v3 }
  0x3e   :  { %1809 = vmatpush3.xpose.msra.mxu0 %v2062_v10  ;;  %1810 = vmatprep.mubr.msk.f32.mxu0 %vm2005_vm0, %v2004_v0 }
  0x3f   :  { %1813 = vmatprep.subr.mxu0 %v2004_v0 }
  0x41   :  { %1761 = vmatmul.mubr.f32.vlgmr.msra.gmra.mrb[0].mxu1 %v109_v4  ;;  %1811 = vmatmul.mubr.f32.vlgmr.msra.gmra.mrb[2].mxu0 %v112_v9 }
  0x42   :  { %1779 = vmatpush3.xpose.msra.mxu1 %v2062_v10  ;;  %1780 = vmatprep.mubr.msk.f32.mxu1 %vm2005_vm0, %v2004_v0 }
  0x43   :  { %1783 = vmatprep.subr.mxu1 %v2004_v0  ;;  %1814 = vmatpush3.xpose.msra.mxu0 %v561_v14 }
  0x44   :  { %1815 = vmatprep.mubr.msk.f32.mxu0 %vm2005_vm0, %v2004_v0  ;;  %1818 = vmatprep.subr.mxu0 %v2004_v0 }
  0x45   :  { %1781 = vmatmul.mubr.f32.vlgmr.msra.gmra.mrb[2].mxu1 %v561_v14 }
  0x46   :  { %1784 = vmatpush3.xpose.msra.mxu1 %v561_v14  ;;  %1785 = vmatprep.mubr.msk.f32.mxu1 %vm2005_vm0, %v2004_v0 }
  0x47   :  { %1788 = vmatprep.subr.mxu1 %v2004_v0 }
  0x49   :  { %1816 = vmatmul.mubr.f32.vlgmr.msra.gmra.mrb[2].mxu0 %v2052_v3 }
  0x4a   :  { %1819 = vmatpush3.xpose.msra.mxu0 %v558_v11  ;;  %1820 = vmatprep.mubr.msk.f32.mxu0 %vm2005_vm0, %v2004_v0 }
  0x4b   :  { %1823 = vmatprep.subr.mxu0 %v2004_v0 }
  0x4d   :  { %1786 = vmatmul.mubr.f32.vlgmr.msra.gmra.mrb[2].mxu1 %v2062_v10 }
  0x4e   :  { %1789 = vmatpush3.xpose.msra.mxu1 %v558_v11  ;;  %1790 = vmatprep.mubr.msk.f32.mxu1 %vm2005_vm0, %v2004_v0 }
  0x4f   :  { %1793 = vmatprep.subr.mxu1 %v2004_v0 }
  0x51   :  { %1821 = vmatmul.mubr.f32.vlgmr.msra.gmra.mrb[2].mxu0 %v109_v4 }
  0x52   :  { %1824 = vmatpush3.xpose.msra.mxu0 %v2062_v10  ;;  %1825 = vmatprep.mubr.msk.f32.mxu0 %vm2005_vm0, %v2004_v0 }
  0x53   :  { %1828 = vmatprep.subr.mxu0 %v2004_v0 }
  0x55   :  { %1791 = vmatmul.mubr.f32.vlgmr.msra.gmra.mrb[2].mxu1 %v558_v11 }
  0x56   :  { %1794 = vmatpush3.xpose.msra.mxu1 %v2062_v10  ;;  %1795 = vmatprep.mubr.msk.f32.mxu1 %vm2005_vm0, %v2004_v0 }
  0x57   :  { %1798 = vmatprep.subr.mxu1 %v2004_v0 }
  0x59   :  { %1826 = vmatmul.mubr.f32.vlgmr.msra.gmra.mrb[2].mxu0 %v110_v6 }
  0x5a   :  { %1829 = vmatpush3.xpose.msra.mxu0 %v559_v12  ;;  %1830 = vmatprep.mubr.msk.f32.mxu0 %vm2005_vm0, %v2004_v0 }
  0x5b   :  { %1833 = vmatprep.subr.mxu0 %v2004_v0 }
  0x5d   :  { %1796 = vmatmul.mubr.f32.vlgmr.msra.gmra.mrb[2].mxu1 %v559_v12 }
  0x5e   :  { %1799 = vmatpush3.xpose.msra.mxu1 %v559_v12  ;;  %1800 = vmatprep.mubr.msk.f32.mxu1 %vm2005_vm0, %v2004_v0 }
  0x5f   :  { %1803 = vmatprep.subr.mxu1 %v2004_v0 }
  0x61   :  { %1831 = vmatmul.mubr.f32.vlgmr.msra.gmra.mrb[2].mxu0 %v2052_v3 }
  0x62   :  { %1834 = vmatpush3.xpose.msra.mxu0 %v2062_v10  ;;  %1835 = vmatprep.mubr.msk.f32.mxu0 %vm2005_vm0, %v2004_v0 }
  0x65   :  { %1801 = vmatmul.mubr.f32.vlgmr.msra.gmra.mrb[2].mxu1 %v2062_v10 }
  0x66   :  { %1804 = vmatpush3.xpose.msra.mxu1 %v2062_v10  ;;  %1805 = vmatprep.mubr.msk.f32.mxu1 %vm2005_vm0, %v2004_v0 }
  0x69   :  { %1836 = vmatmul.mubr.f32.vlgmr.msra.gmra.mrb[2].mxu0 %v2052_v3 }
  0x6d   :  { %1806 = vmatmul.mubr.f32.vlgmr.msra.gmra.mrb[2].mxu1 %v2062_v10 }
 0x110   :  { %v484_v16 = vpop.f32.mrb[0].mxu0 }
 0x111   :  { %v1777_v19 = vpop.f32.mrb[1].mxu0 }
 0x114   :  { %v264_v20 = vpop.f32.mrb[0].mxu1 }
 0x115   :  { %v1838_v21 = vadd.f32 %v484_v16, %v264_v20  ;;  %v1762_v22 = vpop.f32.mrb[1].mxu1 }
 0x117   :  { %v1388_v23 = vsel %vm1387_vm2, %v1838_v21, 0.0  ;;  %v1410_v45 = vmul.f32 2.0, %v1838_v21 }
 0x118   :  { %v1390_v24 = vsel %vm1389_vm3, %v1388_v23, 0.0 }
 0x119   :  { %1391 = vadd.xlane.f32.xlu0 %v1390_v24  ;;  %v1393_v31 = vrot.slane %v1390_v24, 4 }
 0x11b   :  { %v1394_v33 = vadd.f32 %v1393_v31, %v1390_v24 }
 0x11d   :  { %v1395_v35 = vrot.slane %v1394_v33, 2 }
 0x11f   :  { %v1396_v37 = vadd.f32 %v1395_v35, %v1394_v33 }
 0x121   :  { %v1397_v39 = vrot.slane %v1396_v37, 1 }
 0x123   :  { %v1398_v42 = vadd.f32 %v1397_v39, %v1396_v37 }
 0x13c   :  { %v1379_v25 = vpop.f32.mrb[2].mxu0 }
 0x13d   :  { %v1837_v26 = vpop.f32.mrb[3].mxu0  ;;  %v1418_v41 = vmul.f32 2.0, %v1379_v25 }
 0x140   :  { %v933_v27 = vpop.f32.mrb[2].mxu1 }
 0x141   :  { %v1399_v28 = vsel %vm1387_vm2, %v933_v27, 0.0  ;;  %v1807_v29 = vpop.f32.mrb[3].mxu1  ;;  %v1414_v55 = vmul.f32 2.0, %v933_v27 }
 0x142   :  { %v1400_v30 = vsel %vm1389_vm3, %v1399_v28, 0.0 }
 0x143   :  { %1401 = vadd.xlane.f32.xlu0 %v1400_v30  ;;  %v1403_v32 = vrot.slane %v1400_v30, 4 }
 0x145   :  { %v1404_v34 = vadd.f32 %v1403_v32, %v1400_v30 }
 0x147   :  { %v1405_v36 = vrot.slane %v1404_v34, 2 }
 0x149   :  { %v1406_v38 = vadd.f32 %v1405_v36, %v1404_v34 }
 0x14b   :  { %v1407_v40 = vrot.slane %v1406_v38, 1 }
 0x14d   :  { %v1408_v43 = vadd.f32 %v1407_v40, %v1406_v38 }
 0x1a6   :  { %v1392_v44 = vpop.xlane.xlu0 %1391 }
 0x1a7   :  { %v1409_v46 = vadd.f32 %v1398_v42, %v1392_v44  ;;  %v1417_v47 = vadd.f32 %v1408_v43, %v1392_v44 }
 0x1a9   :  { %v1411_v48 = vsub.f32 %v1409_v46, %v1410_v45  ;;  %v1419_v49 = vsub.f32 %v1417_v47, %v1418_v41 }
 0x1ab   :  { %v2126_v50 = vmax.f32 %v1411_v48, 0.0  ;;  %v2128_v51 = vmax.f32 %v1419_v49, 0.0 }
 0x1ad   :  { %v1421_v52 = vsel %vm1389_vm3, %v2126_v50, 0.0  ;;  %v1442_v53 = vsel %vm1389_vm3, %v2128_v51, 0.0 }
 0x1ae   :  { %1422 = vadd.xlane.f32.xlu1 %v1421_v52  ;;  %1443 = vadd.xlane.f32.xlu0 %v1442_v53 }
 0x1d0   :  { %v1402_v54 = vpop.xlane.xlu0 %1401 }
 0x1d1   :  { %v1413_v56 = vadd.f32 %v1408_v43, %v1402_v54 }
 0x1d3   :  { %v1415_v57 = vsub.f32 %v1413_v56, %v1414_v55 }
 0x1d5   :  { %v2134_v58 = vmax.f32 %v1415_v57, 0.0 }
 0x1d7   :  { %v1431_v59 = vsel %vm1389_vm3, %v2134_v58, 0.0 }
 0x1d8   :  { %1432 = vadd.xlane.f32.xlu1 %v1431_v59 }
 0x23b   :  { %v1423_v60 = vpop.xlane.xlu1 %1422  ;;  %v1444_v3 = vpop.xlane.xlu0 %1443 }
 0x23c   :  { %v1424_v61 = vrot.slane %v1423_v60, 4  ;;  %v1445_v4 = vrot.slane %v1444_v3, 4 }
 0x23e   :  { %v1425_v62 = vadd.f32 %v1424_v61, %v1423_v60  ;;  %v1446_v5 = vadd.f32 %v1445_v4, %v1444_v3 }
 0x240   :  { %v1426_v63 = vrot.slane %v1425_v62, 2  ;;  %v1447_v6 = vrot.slane %v1446_v5, 2 }
 0x242   :  { %v1427_v0 = vadd.f32 %v1426_v63, %v1425_v62  ;;  %v1448_v10 = vadd.f32 %v1447_v6, %v1446_v5 }
 0x244   :  { %v1428_v1 = vrot.slane %v1427_v0, 1  ;;  %v1449_v13 = vrot.slane %v1448_v10, 1 }
 0x246   :  { %v1429_v2 = vadd.f32 %v1428_v1, %v1427_v0  ;;  %v1450_v16 = vadd.f32 %v1449_v13, %v1448_v10 }
 0x248   :  { %1867 = vpush %v1429_v2 }
 0x265   :  { %v1433_v7 = vpop.xlane.xlu1 %1432 }
 0x266   :  { %v1434_v8 = vrot.slane %v1433_v7, 4 }
 0x268   :  { %v1435_v9 = vadd.f32 %v1434_v8, %v1433_v7 }
 0x26a   :  { %v1436_v11 = vrot.slane %v1435_v9, 2 }
 0x26c   :  { %v1437_v12 = vadd.f32 %v1436_v11, %v1435_v9 }
 0x26e   :  { %v1438_v14 = vrot.slane %v1437_v12, 1 }
 0x270   :  { %v1439_v15 = vadd.f32 %v1438_v14, %v1437_v12 }
 0x272   :  { %1869 = vpush %v1439_v15 }
 0x273   :  { %1871 = vpush %v1450_v16 }
 0x279   :  { %s1868_s1 = spop %1867 }
 0x2a3   :  { %s1870_s4 = spop %1869 }
 0x2a4   :  { %s1441_s5 = sadd.f32 %s1870_s4, %s1868_s1  ;;  %s1872_s6 = spop %1871 }
 0x2a5   :  { %s1452_s7 = smul.f32 2.0, %s1872_s6 }
 0x2a7   :  { %s1453_s8 = sadd.f32 %s1452_s7, %s1441_s5 }
 0x2a9   :  { %s1456_s9 = smul.f32 0.004166667, %s1453_s8 }
 0x2ab   :  { %s1459_s10 = smul.f32 0.25, %s1456_s9 }
 0x2ad   :  { %v1460_v17 = vstv %s1459_s10 }
 0x2ae   :  { %1910 = vrcp.f32 %v1460_v17 }
 0x2b8   :  { %v1911_v18 = vpop.eup %1910 }
 0x2b9   :  { %1873 = vpush %v1911_v18 }
 0x2ea   :  { %s1874_s11 = spop %1873 }
 0x2eb   :  { %s2138_s12 = smul.f32 -1.0, %s1874_s11 }
 0x2ed   :  { %v1464_v19 = vstv %s2138_s12  ;;  %s1507_s13 = smul.f32 0.5, %s2138_s12 }
 0x2ee   :  { %s1551_s14 = smul.f32 0.25, %s2138_s12  ;;  %v1468_v20 = vmul.f32 %v1464_v19, %v2134_v58  ;;  %v1465_v21 = vmul.f32 %v1464_v19, %v2126_v50  ;;  %v1471_v22 = vmul.f32 %v1464_v19, %v2128_v51 }
 0x2ef   :  { %v1508_v23 = vstv %s1507_s13  ;;  %s1595_s15 = smul.f32 0.125, %s2138_s12 }
 0x2f0   :  { %v1469_v24 = vmul.f32 1.442695, %v1468_v20  ;;  %v1466_v25 = vmul.f32 1.442695, %v1465_v21  ;;  %v1509_v26 = vmul.f32 %v1508_v23, %v2126_v50  ;;  %v1552_v27 = vstv %s1551_s14  ;;  %s1639_s16 = smul.f32 0.0625, %s2138_s12 }
 0x2f1   :  { %v1472_v28 = vmul.f32 1.442695, %v1471_v22  ;;  %v1515_v29 = vmul.f32 %v1508_v23, %v2128_v51  ;;  %v1512_v30 = vmul.f32 %v1508_v23, %v2134_v58  ;;  %v1556_v33 = vmul.f32 %v1552_v27, %v2134_v58 }
 0x2f2   :  { %1912 = vpow2.f32 %v1469_v24  ;;  %v1510_v31 = vmul.f32 1.442695, %v1509_v26  ;;  %v1596_v34 = vstv %s1595_s15  ;;  %v1553_v36 = vmul.f32 %v1552_v27, %v2126_v50 }
 0x2f3   :  { %1914 = vpow2.f32 %v1466_v25  ;;  %v1516_v32 = vmul.f32 1.442695, %v1515_v29  ;;  %v1513_v35 = vmul.f32 1.442695, %v1512_v30  ;;  %v1557_v37 = vmul.f32 1.442695, %v1556_v33 }
 0x2f4   :  { %1916 = vpow2.f32 %v1510_v31  ;;  %v1597_v38 = vmul.f32 %v1596_v34, %v2126_v50  ;;  %v1554_v39 = vmul.f32 1.442695, %v1553_v36  ;;  %v1559_v40 = vmul.f32 %v1552_v27, %v2128_v51 }
 0x2f5   :  { %1918 = vpow2.f32 %v1472_v28  ;;  %v1640_v42 = vstv %s1639_s16  ;;  %v1603_v44 = vmul.f32 %v1596_v34, %v2128_v51  ;;  %v1600_v48 = vmul.f32 %v1596_v34, %v2134_v58 }
 0x2f6   :  { %1920 = vpow2.f32 %v1516_v32  ;;  %v1598_v43 = vmul.f32 1.442695, %v1597_v38  ;;  %v1560_v47 = vmul.f32 1.442695, %v1559_v40  ;;  %v1644_v55 = vmul.f32 %v1640_v42, %v2134_v58 }
 0x2f7   :  { %1922 = vpow2.f32 %v1513_v35  ;;  %v1604_v54 = vmul.f32 1.442695, %v1603_v44  ;;  %v1601_v57 = vmul.f32 1.442695, %v1600_v48  ;;  %v1641_v59 = vmul.f32 %v1640_v42, %v2126_v50 }
 0x2f8   :  { %1924 = vpow2.f32 %v1557_v37  ;;  %v1645_v63 = vmul.f32 1.442695, %v1644_v55  ;;  %v1647_v58 = vmul.f32 %v1640_v42, %v2128_v51 }
 0x2f9   :  { %1926 = vpow2.f32 %v1554_v39  ;;  %v1642_v1 = vmul.f32 1.442695, %v1641_v59 }
 0x2fa   :  { %1928 = vpow2.f32 %v1598_v43  ;;  %v1648_v5 = vmul.f32 1.442695, %v1647_v58 }
 0x2fb   :  { %1930 = vpow2.f32 %v1560_v47 }
 0x2fc   :  { %v1913_v41 = vpop.eup %1912  ;;  %1932 = vpow2.f32 %v1604_v54 }
 0x2fd   :  { %v1915_v45 = vpop.eup %1914  ;;  %v1485_v46 = vsel %vm1389_vm3, %v1913_v41, 0.0  ;;  %1934 = vpow2.f32 %v1601_v57 }
 0x2fe   :  { %v1917_v49 = vpop.eup %1916  ;;  %1486 = vadd.xlane.f32.xlu0 %v1485_v46  ;;  %v1474_v52 = vsel %vm1389_vm3, %v1915_v45, 0.0  ;;  %1936 = vpow2.f32 %v1645_v63 }
 0x2ff   :  { %v1919_v53 = vpop.eup %1918  ;;  %1475 = vadd.xlane.f32.xlu1 %v1474_v52  ;;  %v1518_v56 = vsel %vm1389_vm3, %v1917_v49, 0.0  ;;  %1938 = vpow2.f32 %v1642_v1 }
 0x300   :  { %v1921_v60 = vpop.eup %1920  ;;  %v1496_v61 = vsel %vm1389_vm3, %v1919_v53, 0.0  ;;  %1940 = vpow2.f32 %v1648_v5 }
 0x301   :  { %v1923_v62 = vpop.eup %1922  ;;  %v1540_v0 = vsel %vm1389_vm3, %v1921_v60, 0.0 }
 0x302   :  { %1519 = vadd.xlane.f32.xlu0 %v1518_v56  ;;  %v1925_v2 = vpop.eup %1924  ;;  %v1529_v3 = vsel %vm1389_vm3, %v1923_v62, 0.0 }
 0x303   :  { %1497 = vadd.xlane.f32.xlu1 %v1496_v61  ;;  %v1927_v4 = vpop.eup %1926  ;;  %v1573_v50 = vsel %vm1389_vm3, %v1925_v2, 0.0 }
 0x304   :  { %v1929_v6 = vpop.eup %1928  ;;  %v1562_v7 = vsel %vm1389_vm3, %v1927_v4, 0.0 }
 0x305   :  { %v1931_v8 = vpop.eup %1930  ;;  %v1606_v9 = vsel %vm1389_vm3, %v1929_v6, 0.0 }
 0x306   :  { %1541 = vadd.xlane.f32.xlu0 %v1540_v0  ;;  %v1933_v51 = vpop.eup %1932  ;;  %v1584_v10 = vsel %vm1389_vm3, %v1931_v8, 0.0 }
 0x307   :  { %1530 = vadd.xlane.f32.xlu1 %v1529_v3  ;;  %v1935_v11 = vpop.eup %1934  ;;  %v1628_v12 = vsel %vm1389_vm3, %v1933_v51, 0.0 }
 0x308   :  { %v1937_v13 = vpop.eup %1936  ;;  %v1617_v14 = vsel %vm1389_vm3, %v1935_v11, 0.0 }
 0x309   :  { %v1939_v15 = vpop.eup %1938  ;;  %v1661_v16 = vsel %vm1389_vm3, %v1937_v13, 0.0 }
 0x30a   :  { %1574 = vadd.xlane.f32.xlu0 %v1573_v50  ;;  %v1650_v17 = vsel %vm1389_vm3, %v1939_v15, 0.0  ;;  %v1941_v18 = vpop.eup %1940 }
 0x30b   :  { %1563 = vadd.xlane.f32.xlu1 %v1562_v7  ;;  %v1672_v19 = vsel %vm1389_vm3, %v1941_v18, 0.0 }
 0x30e   :  { %1607 = vadd.xlane.f32.xlu0 %v1606_v9 }
 0x30f   :  { %1585 = vadd.xlane.f32.xlu1 %v1584_v10 }
 0x312   :  { %1629 = vadd.xlane.f32.xlu0 %v1628_v12 }
 0x313   :  { %1618 = vadd.xlane.f32.xlu1 %v1617_v14 }
 0x316   :  { %1662 = vadd.xlane.f32.xlu0 %v1661_v16 }
 0x317   :  { %1651 = vadd.xlane.f32.xlu1 %v1650_v17 }
 0x31b   :  { %1673 = vadd.xlane.f32.xlu1 %v1672_v19 }
 0x38b   :  { %v1487_v20 = vpop.xlane.xlu0 %1486 }
 0x38c   :  { %v1488_v21 = vrot.slane %v1487_v20, 4  ;;  %v1476_v22 = vpop.xlane.xlu1 %1475 }
 0x38d   :  { %v1477_v23 = vrot.slane %v1476_v22, 4 }
 0x38e   :  { %v1489_v24 = vadd.f32 %v1488_v21, %v1487_v20 }
 0x38f   :  { %v1478_v25 = vadd.f32 %v1477_v23, %v1476_v22  ;;  %v1520_v26 = vpop.xlane.xlu0 %1519 }
 0x390   :  { %v1490_v27 = vrot.slane %v1489_v24, 2  ;;  %v1521_v28 = vrot.slane %v1520_v26, 4  ;;  %v1498_v29 = vpop.xlane.xlu1 %1497 }
 0x391   :  { %v1479_v30 = vrot.slane %v1478_v25, 2  ;;  %v1499_v31 = vrot.slane %v1498_v29, 4 }
 0x392   :  { %v1522_v32 = vadd.f32 %v1521_v28, %v1520_v26  ;;  %v1491_v33 = vadd.f32 %v1490_v27, %v1489_v24 }
 0x393   :  { %v1500_v34 = vadd.f32 %v1499_v31, %v1498_v29  ;;  %v1542_v35 = vpop.xlane.xlu0 %1541  ;;  %v1480_v36 = vadd.f32 %v1479_v30, %v1478_v25 }
 0x394   :  { %v1523_v37 = vrot.slane %v1522_v32, 2  ;;  %v1543_v38 = vrot.slane %v1542_v35, 4  ;;  %v1531_v39 = vpop.xlane.xlu1 %1530  ;;  %v1492_v40 = vrot.slane %v1491_v33, 1 }
 0x395   :  { %v1501_v41 = vrot.slane %v1500_v34, 2  ;;  %v1532_v42 = vrot.slane %v1531_v39, 4  ;;  %v1481_v43 = vrot.slane %v1480_v36, 1 }
 0x396   :  { %v1544_v44 = vadd.f32 %v1543_v38, %v1542_v35  ;;  %v1493_v45 = vadd.f32 %v1492_v40, %v1491_v33  ;;  %v1524_v46 = vadd.f32 %v1523_v37, %v1522_v32 }
 0x397   :  { %v1533_v47 = vadd.f32 %v1532_v42, %v1531_v39  ;;  %v1575_v48 = vpop.xlane.xlu0 %1574  ;;  %v1482_v49 = vadd.f32 %v1481_v43, %v1480_v36  ;;  %v1502_v52 = vadd.f32 %v1501_v41, %v1500_v34 }
 0x398   :  { %v1545_v53 = vrot.slane %v1544_v44, 2  ;;  %v1576_v54 = vrot.slane %v1575_v48, 4  ;;  %v1564_v55 = vpop.xlane.xlu1 %1563  ;;  %v1525_v56 = vrot.slane %v1524_v46, 1 }
 0x399   :  { %v1534_v57 = vrot.slane %v1533_v47, 2  ;;  %v1565_v59 = vrot.slane %v1564_v55, 4  ;;  %1875 = vpush %v1482_v49  ;;  %v1503_v60 = vrot.slane %v1502_v52, 1 }
 0x39a   :  { %v1577_v61 = vadd.f32 %v1576_v54, %v1575_v48  ;;  %1877 = vpush %v1493_v45  ;;  %v1526_v62 = vadd.f32 %v1525_v56, %v1524_v46  ;;  %v1546_v63 = vadd.f32 %v1545_v53, %v1544_v44 }
 0x39b   :  { %v1566_v0 = vadd.f32 %v1565_v59, %v1564_v55  ;;  %v1608_v1 = vpop.xlane.xlu0 %1607  ;;  %v1504_v58 = vadd.f32 %v1503_v60, %v1502_v52  ;;  %v1535_v2 = vadd.f32 %v1534_v57, %v1533_v47 }
 0x39c   :  { %v1578_v3 = vrot.slane %v1577_v61, 2  ;;  %v1609_v4 = vrot.slane %v1608_v1, 4  ;;  %v1586_v50 = vpop.xlane.xlu1 %1585  ;;  %v1547_v5 = vrot.slane %v1546_v63, 1 }
 0x39d   :  { %v1567_v6 = vrot.slane %v1566_v0, 2  ;;  %v1587_v7 = vrot.slane %v1586_v50, 4  ;;  %1879 = vpush %v1504_v58  ;;  %v1536_v8 = vrot.slane %v1535_v2, 1 }
 0x39e   :  { %v1610_v9 = vadd.f32 %v1609_v4, %v1608_v1  ;;  %1881 = vpush %v1526_v62  ;;  %v1548_v51 = vadd.f32 %v1547_v5, %v1546_v63  ;;  %v1579_v10 = vadd.f32 %v1578_v3, %v1577_v61 }
 0x39f   :  { %v1588_v11 = vadd.f32 %v1587_v7, %v1586_v50  ;;  %v1630_v12 = vpop.xlane.xlu0 %1629  ;;  %v1537_v13 = vadd.f32 %v1536_v8, %v1535_v2  ;;  %v1568_v14 = vadd.f32 %v1567_v6, %v1566_v0 }
 0x3a0   :  { %v1611_v15 = vrot.slane %v1610_v9, 2  ;;  %v1631_v16 = vrot.slane %v1630_v12, 4  ;;  %v1619_v17 = vpop.xlane.xlu1 %1618  ;;  %v1580_v18 = vrot.slane %v1579_v10, 1 }
 0x3a1   :  { %v1589_v19 = vrot.slane %v1588_v11, 2  ;;  %v1620_v20 = vrot.slane %v1619_v17, 4  ;;  %1883 = vpush %v1537_v13  ;;  %v1569_v21 = vrot.slane %v1568_v14, 1 }
 0x3a2   :  { %v1632_v22 = vadd.f32 %v1631_v16, %v1630_v12  ;;  %1885 = vpush %v1548_v51  ;;  %v1581_v23 = vadd.f32 %v1580_v18, %v1579_v10  ;;  %v1612_v24 = vadd.f32 %v1611_v15, %v1610_v9 }
 0x3a3   :  { %v1621_v25 = vadd.f32 %v1620_v20, %v1619_v17  ;;  %v1663_v26 = vpop.xlane.xlu0 %1662  ;;  %v1570_v27 = vadd.f32 %v1569_v21, %v1568_v14  ;;  %v1590_v28 = vadd.f32 %v1589_v19, %v1588_v11 }
 0x3a4   :  { %v1633_v29 = vrot.slane %v1632_v22, 2  ;;  %v1664_v30 = vrot.slane %v1663_v26, 4  ;;  %v1652_v31 = vpop.xlane.xlu1 %1651  ;;  %v1613_v32 = vrot.slane %v1612_v24, 1 }
 0x3a5   :  { %v1622_v33 = vrot.slane %v1621_v25, 2  ;;  %v1653_v34 = vrot.slane %v1652_v31, 4  ;;  %1887 = vpush %v1570_v27  ;;  %v1591_v35 = vrot.slane %v1590_v28, 1 }
 0x3a6   :  { %v1665_v36 = vadd.f32 %v1664_v30, %v1663_v26  ;;  %1889 = vpush %v1581_v23  ;;  %v1614_v37 = vadd.f32 %v1613_v32, %v1612_v24  ;;  %v1634_v38 = vadd.f32 %v1633_v29, %v1632_v22 }
 0x3a7   :  { %v1654_v39 = vadd.f32 %v1653_v34, %v1652_v31  ;;  %v1592_v40 = vadd.f32 %v1591_v35, %v1590_v28  ;;  %v1623_v41 = vadd.f32 %v1622_v33, %v1621_v25 }
 0x3a8   :  { %v1666_v42 = vrot.slane %v1665_v36, 2  ;;  %v1674_v43 = vpop.xlane.xlu1 %1673  ;;  %v1635_v44 = vrot.slane %v1634_v38, 1 }
 0x3a9   :  { %v1655_v45 = vrot.slane %v1654_v39, 2  ;;  %v1675_v46 = vrot.slane %v1674_v43, 4  ;;  %1891 = vpush %v1592_v40  ;;  %v1624_v47 = vrot.slane %v1623_v41, 1 }
 0x3aa   :  { %v1667_v48 = vadd.f32 %v1666_v42, %v1665_v36  ;;  %1893 = vpush %v1614_v37  ;;  %v1636_v49 = vadd.f32 %v1635_v44, %v1634_v38 }
 0x3ab   :  { %v1676_v52 = vadd.f32 %v1675_v46, %v1674_v43  ;;  %v1625_v53 = vadd.f32 %v1624_v47, %v1623_v41  ;;  %v1656_v54 = vadd.f32 %v1655_v45, %v1654_v39 }
 0x3ac   :  { %v1668_v55 = vrot.slane %v1667_v48, 1 }
 0x3ad   :  { %v1677_v56 = vrot.slane %v1676_v52, 2  ;;  %1895 = vpush %v1625_v53  ;;  %v1657_v57 = vrot.slane %v1656_v54, 1 }
 0x3ae   :  { %1897 = vpush %v1636_v49  ;;  %v1669_v59 = vadd.f32 %v1668_v55, %v1667_v48 }
 0x3af   :  { %v1678_v60 = vadd.f32 %v1677_v56, %v1676_v52  ;;  %v1658_v61 = vadd.f32 %v1657_v57, %v1656_v54 }
 0x3b1   :  { %1899 = vpush %v1658_v61  ;;  %v1679_v62 = vrot.slane %v1678_v60, 1 }
 0x3b2   :  { %1901 = vpush %v1669_v59 }
 0x3b3   :  { %v1680_v63 = vadd.f32 %v1679_v62, %v1678_v60 }
 0x3b5   :  { %1903 = vpush %v1680_v63 }
 0x3ca   :  { %s1876_s17 = spop %1875 }
 0x3cb   :  { %s1878_s18 = spop %1877 }
 0x3ce   :  { %s1880_s19 = spop %1879 }
 0x3cf   :  { %s1882_s20 = spop %1881 }
 0x3d0   :  { %s1528_s24 = sadd.f32 %s1882_s20, %s1876_s17 }
 0x3d2   :  { %s1884_s21 = spop %1883 }
 0x3d3   :  { %s1886_s22 = spop %1885  ;;  %s1539_s26 = sadd.f32 %s1884_s21, %s1878_s18 }
 0x3d4   :  { %s1550_s28 = sadd.f32 %s1886_s22, %s1880_s19  ;;  %s1986_s22 = scalar_lea.hbm %s2189_s2, 16 }
 0x3d5   :  { %p1987_p2 = scmp.ne.s32.totalorder %s2189_s2, %s1986_s22  ;;  %p1990_p3 = scmp.lt.u32.totalorder %s1986_s22, %s2189_s2 }
 0x3d6   :  { %s1888_s23 = spop %1887 }
 0x3d7   :  { %s1890_s25 = spop %1889  ;;  %s1572_s29 = sadd.f32 %s1888_s23, %s1528_s24 }
 0x3d8   :  { %s1583_s0 = sadd.f32 %s1890_s25, %s1539_s26  ;;  %p1992_p4 = pnand %p1990_p3, %p1987_p2 }
 0x3da   :  { %s1892_s27 = spop %1891 }
 0x3db   :  { %s1894_s30 = spop %1893  ;;  %s1594_s1 = sadd.f32 %s1892_s27, %s1550_s28 }
 0x3dc   :  { %s1616_s4 = sadd.f32 %s1894_s30, %s1572_s29 }
 0x3de   :  { %s1896_s3 = spop %1895 }
 0x3df   :  { %s1898_s5 = spop %1897  ;;  %s1627_s6 = sadd.f32 %s1896_s3, %s1583_s0 }
 0x3e0   :  { %s1638_s11 = sadd.f32 %s1898_s5, %s1594_s1 }
 0x3e2   :  { %s1900_s7 = spop %1899 }
 0x3e3   :  { %s1660_s8 = sadd.f32 %s1900_s7, %s1616_s4  ;;  %s1902_s9 = spop %1901 }
 0x3e4   :  { %s1671_s10 = sadd.f32 %s1902_s9, %s1627_s6 }
 0x3e5   :  { %s1685_s12 = smul.f32 0.015625, %s1660_s8 }
 0x3e6   :  { %s1904_s13 = spop %1903  ;;  %s1688_s14 = smul.f32 0.015625, %s1671_s10 }
 0x3e7   :  { %s1682_s15 = sadd.f32 %s1904_s13, %s1638_s11 }
 0x3e8   :  { %s1692_s17 = sadd.f32 %s1688_s14, %s1685_s12 }
 0x3e9   :  { %s1691_s16 = smul.f32 0.015625, %s1682_s15 }
 0x3eb   :  { %s1693_s18 = smul.f32 2.0, %s1691_s16 }
 0x3ed   :  { %s1694_s19 = ssub.f32 %s1692_s17, %s1693_s18 }
 0x3ef   :  { %1696 = sst [smem:[#allocation7]] %s1694_s19 }
 0x3f0   :  { %1995 = shalt.err (!%p1992_p4)
}
 0x3f1   :  { %s2006_s27 = smov [#allocation7]  }
 0x3f2   :  { %1704 = dma.smem_to_hbm %s2006_s27, 16, %s2189_s2, [#allocation4]  }
 0x3f3   :  { %2000 = dma.done.wait [#allocation4], 16  }
 0x3f4   :  { %2001 = vsyncadd [#allocation4], 4294967280 }
 0x3f5   :  { %1708 = sfence }
 0x3f6   :  { %1709 = vsyncpa [#allocation3], 1 }
 0x3f7   :  { %1710 = vsyncpa [#allocation6], 1 }
 0x3f8   :  { %1711 = vsyncpa [#allocation4], 1 }

</bundles_post_ra>
